<compile_context>
chip_gen: v7x
topology: tpu7x:2x2x1
jax: 0.10.0
libtpu: 0.0.40
codegen_flags: <defaults>
</compile_context>

<pallas_src>
import math
import functools

import jax
import jax.numpy as jnp
from jax.experimental import pallas as pl
from jax.experimental.pallas import tpu as pltpu


def _gelu_tanh(x):
    # tanh-approx GELU (tanh goes to the EUP -> free bundle slot)
    c = math.sqrt(2.0 / math.pi)
    return 0.5 * x * (1.0 + jnp.tanh(c * (x + 0.044715 * x * x * x)))


def _round_up(v, m):
    return ((v + m - 1) // m) * m


def _default_gelu_dtype():
    # bf16 VALU/EUP exist on v6e/v7x; keep f32 on older parts (e.g. v5e).
    try:
        kind = jax.devices()[0].device_kind.lower()
    except Exception:
        return jnp.float32
    if "v6" in kind or "v7" in kind:
        return jnp.bfloat16
    return jnp.float32


def time_encode_kernel(x_ref, freq_ref, w1s_ref, w1c_ref, b1_ref, w2_ref, b2_ref,
                       o_ref, *, mxu_dtype, gelu_dtype):
    # x_ref:    [TB, 1]            timesteps (f32)
    # freq_ref: [1, half_dim]      frequencies (f32, grid-invariant)
    # w1s_ref:  [half_dim, H]      W1 rows matched to sin(emb)   (mxu_dtype)
    # w1c_ref:  [half_dim, H]      W1 rows matched to cos(emb)   (mxu_dtype)
    # b1_ref:   [1, H]             (f32)
    # w2_ref:   [H, C_pad]         (mxu_dtype)
    # b2_ref:   [1, C_pad]         (f32)
    # o_ref:    [TB, C_pad]
    emb = x_ref[...] * freq_ref[...]                         # [TB, half_dim]
    s = jnp.sin(emb)
    c = jnp.cos(emb)

    # two small-K MXU dots (== concat(sin, cos) @ W1), f32 accumulation
    h = jnp.dot(s.astype(mxu_dtype), w1s_ref[...], preferred_element_type=jnp.float32)
    h = h + jnp.dot(c.astype(mxu_dtype), w1c_ref[...], preferred_element_type=jnp.float32)
    h = h + b1_ref[...]
    h = _gelu_tanh(h.astype(gelu_dtype))                     # bf16 on v6e/v7x

    y = jnp.dot(h.astype(mxu_dtype), w2_ref[...], preferred_element_type=jnp.float32)
    y = y + b2_ref[...]
    o_ref[...] = y.astype(o_ref.dtype)


def prepare_params(raw_params, *, channel_time, theta=10000.0, mxu_dtype=jnp.bfloat16):
    """One-time parameter prep: freq table, W1 split, bias reshape, lane-dense W2 pad, casts."""
    w1, b1, w2, b2 = raw_params
    dim = channel_time // 4
    half_dim = dim // 2
    hidden = channel_time // 2
    c_pad = _round_up(channel_time, 128)                     # lane-dense output width

    scale = math.log(theta) / (half_dim - 1)
    freq = jnp.exp(jnp.arange(half_dim, dtype=jnp.float32) * -scale).reshape(1, half_dim)

    w1_sin = w1[:half_dim].astype(mxu_dtype)                 # multiplied by sin(emb)
    w1_cos = w1[half_dim:].astype(mxu_dtype)                 # multiplied by cos(emb)

    if c_pad != channel_time:
        w2 = jnp.pad(w2, ((0, 0), (0, c_pad - channel_time)))
        b2 = jnp.pad(b2, (0, c_pad - channel_time))

    return (freq,
            w1_sin, w1_cos,
            b1.reshape(1, hidden).astype(jnp.float32),
            w2.astype(mxu_dtype),
            b2.reshape(1, c_pad).astype(jnp.float32))


def time_encode(x, prepared_params, *, channel_time, mxu_dtype=jnp.bfloat16,
                out_dtype=jnp.float32, tile_b=1024, gelu_dtype=None):
    """x: [bs] float32 timesteps -> [bs, channel_time] (out_dtype)."""
    assert channel_time % 8 == 0, "channel_time must be divisible by 8"
    dim = channel_time // 4
    half_dim = dim // 2
    hidden = channel_time // 2
    assert half_dim > 1, "channel_time too small (half_dim must be > 1)"

    freq, w1s, w1c, b1, w2, b2 = prepared_params
    c_pad = w2.shape[1]                                      # multiple of 128
    bs = x.shape[0]
    if gelu_dtype is None:
        gelu_dtype = _default_gelu_dtype()

    w_isize = jnp.dtype(mxu_dtype).itemsize
    out_isize = jnp.dtype(out_dtype).itemsize
    weight_bytes = ((w1s.size + w1c.size + w2.size) * w_isize
                    + (freq.size + b1.size + b2.size) * 4)   # single-buffered constants

    # VMEM working budget: keep well under v7x's 64 MiB physical (leave headroom).
    try:
        phys_vmem = pltpu.get_tpu_info().vmem_capacity_bytes
    except Exception:
        phys_vmem = 64 << 20
    budget = min(48 << 20, int(0.7 * phys_vmem))

    per_row_bytes = (2 * 1 * 4                               # x tile, double-buffered
                     + 2 * c_pad * out_isize                 # out tile, double-buffered
                     + (2 * dim + 2 * hidden + 2 * c_pad) * 4)  # live intermediates
    tb_cap = max(8, (budget - weight_bytes) // per_row_bytes)

    # batch tile: as big as VMEM allows (per-step overhead ~0.35 us), multiple of 8
    tb = min(tile_b, tb_cap, _round_up(bs, 8))
    tb = max(8, (tb // 8) * 8)
    # keep grid >= 2 when there is enough work so both v7x TensorCores can engage
    if bs > 8 and tb >= bs:
        tb = max(8, _round_up(pl.cdiv(bs, 2), 8))
    grid = (pl.cdiv(bs, tb),)                                # Pallas clips the edge block

    x2d = x.astype(jnp.float32).reshape(bs, 1)               # no batch padding needed

    vmem_limit = max(16 << 20,
                     min(48 << 20, int(1.25 * (weight_bytes + tb * per_row_bytes))))

    flops = 2 * bs * (dim * hidden + hidden * c_pad)
    transcendentals = bs * (dim + hidden)                    # sin, cos, tanh
    bytes_accessed = bs * 4 + weight_bytes + bs * c_pad * out_isize

    def const_spec(shape):
        # grid-invariant operand: resident in VMEM, single-buffered
        return pl.BlockSpec(shape, lambda i: (0, 0), pipeline_mode=pl.Buffered(1))

    kernel = functools.partial(time_encode_kernel,
                               mxu_dtype=mxu_dtype, gelu_dtype=gelu_dtype)

    out = pl.pallas_call(
        kernel,
        out_shape=jax.ShapeDtypeStruct((bs, c_pad), out_dtype),
        grid=grid,
        in_specs=[
            pl.BlockSpec((tb, 1), lambda i: (i, 0)),         # x: pipelined per grid step
            const_spec((1, half_dim)),                       # freq
            const_spec((half_dim, hidden)),                  # W1 (sin half)
            const_spec((half_dim, hidden)),                  # W1 (cos half)
            const_spec((1, hidden)),                         # b1
            const_spec((hidden, c_pad)),                     # W2
            const_spec((1, c_pad)),                          # b2
        ],
        out_specs=pl.BlockSpec((tb, c_pad), lambda i: (i, 0)),
        compiler_params=pltpu.CompilerParams(
            dimension_semantics=("parallel",),
            vmem_limit_bytes=vmem_limit),
        cost_estimate=pl.CostEstimate(flops=flops,
                                      transcendentals=transcendentals,
                                      bytes_accessed=bytes_accessed),
    )(x2d, freq, w1s, w1c, b1, w2, b2)

    if c_pad != channel_time:
        out = out[:, :channel_time]  # only hit when channel_time % 128 != 0
    return out


def init_params(key, channel_time):
    dim = channel_time // 4
    hidden = channel_time // 2
    k1, k2, k3, k4 = jax.random.split(key, 4)
    # deterministic synthetic params (Linear weights stored as [in, out])
    w1 = jax.random.normal(k1, (dim, hidden), jnp.float32) * 0.05
    b1 = jax.random.normal(k2, (hidden,), jnp.float32) * 0.05
    w2 = jax.random.normal(k3, (hidden, channel_time), jnp.float32) * 0.05
    b2 = jax.random.normal(k4, (channel_time,), jnp.float32) * 0.05
    return (w1, b1, w2, b2)


def reference(x, params, *, channel_time, theta=10000.0):
    """Pure-JAX f32 reference matching the PyTorch forward."""
    dim = channel_time // 4
    half_dim = dim // 2
    w1, b1, w2, b2 = params
    scale = math.log(theta) / (half_dim - 1)
    freq = jnp.exp(jnp.arange(half_dim, dtype=jnp.float32) * -scale)
    emb = x[:, None] * freq[None, :]
    emb = jnp.concatenate([jnp.sin(emb), jnp.cos(emb)], axis=-1)
    h = _gelu_tanh(emb @ w1 + b1)
    return h @ w2 + b2


if __name__ == "__main__":
    channel_time = 128
    bs = 8

    key = jax.random.PRNGKey(0)
    kx, kp = jax.random.split(key)
    # timesteps: small positive floats (e.g. diffusion step indices)
    x = jax.random.uniform(kx, (bs,), jnp.float32, minval=0.0, maxval=1000.0)
    raw_params = init_params(kp, channel_time)
    params = prepare_params(raw_params, channel_time=channel_time)   # one-time prep

    out = time_encode(x, params, channel_time=channel_time)
    out = jax.block_until_ready(out)

    ref = reference(x, raw_params, channel_time=channel_time)
    assert out.shape == (bs, channel_time)
    # tolerance accounts for bf16 MXU operands (+ bf16 GELU on v6e/v7x), f32 accumulation
    assert jnp.allclose(out, ref, atol=2e-2, rtol=2e-2), "mismatch vs reference"
    print("KERNEL_OK")
</pallas_src>

<mosaic_0001>
module attributes {stable_mosaic.version = 11 : i64} {
  func.func @time_encode_kernel(%arg0: i32, %arg1: memref<8x1xf32, #tpu.memory_space<vmem>>, %arg2: memref<1x16xf32, #tpu.memory_space<vmem>>, %arg3: memref<16x64xbf16, #tpu.memory_space<vmem>>, %arg4: memref<16x64xbf16, #tpu.memory_space<vmem>>, %arg5: memref<1x64xf32, #tpu.memory_space<vmem>>, %arg6: memref<64x128xbf16, #tpu.memory_space<vmem>>, %arg7: memref<1x128xf32, #tpu.memory_space<vmem>>, %arg8: memref<8x128xf32, #tpu.memory_space<vmem>>) attributes {dimension_semantics = [#tpu.dimension_semantics<parallel>], iteration_bounds = array<i64: 1>, scalar_prefetch = 0 : i64, scratch_operands = 0 : i64, tpu.core_type = #tpu.core_type<tc>, window_params = [{transform_indices = @transform_0, window_bounds = array<i64: 8, 1>}, {pipeline_mode = #tpu.pipeline_mode<synchronous>, transform_indices = @transform_1, window_bounds = array<i64: 1, 16>}, {pipeline_mode = #tpu.pipeline_mode<synchronous>, transform_indices = @transform_2, window_bounds = array<i64: 16, 64>}, {pipeline_mode = #tpu.pipeline_mode<synchronous>, transform_indices = @transform_3, window_bounds = array<i64: 16, 64>}, {pipeline_mode = #tpu.pipeline_mode<synchronous>, transform_indices = @transform_4, window_bounds = array<i64: 1, 64>}, {pipeline_mode = #tpu.pipeline_mode<synchronous>, transform_indices = @transform_5, window_bounds = array<i64: 64, 128>}, {pipeline_mode = #tpu.pipeline_mode<synchronous>, transform_indices = @transform_6, window_bounds = array<i64: 1, 128>}, {transform_indices = @transform_7, window_bounds = array<i64: 8, 128>}]} {
    %c0 = arith.constant 0 : index
    %c0_0 = arith.constant 0 : index
    %0 = vector.load %arg1[%c0, %c0_0] : memref<8x1xf32, #tpu.memory_space<vmem>>, vector<8x1xf32>
    %c0_1 = arith.constant 0 : index
    %c0_2 = arith.constant 0 : index
    %1 = vector.load %arg2[%c0_1, %c0_2] : memref<1x16xf32, #tpu.memory_space<vmem>>, vector<1x16xf32>
    %2 = vector.broadcast %0 : vector<8x1xf32> to vector<8x16xf32>
    %3 = vector.broadcast %1 : vector<1x16xf32> to vector<8x16xf32>
    %4 = arith.mulf %2, %3 : vector<8x16xf32>
    %5 = math.sin %4 : vector<8x16xf32>
    %6 = math.cos %4 : vector<8x16xf32>
    %7 = arith.truncf %5 : vector<8x16xf32> to vector<8x16xbf16>
    %c0_3 = arith.constant 0 : index
    %c0_4 = arith.constant 0 : index
    %8 = vector.load %arg3[%c0_3, %c0_4] : memref<16x64xbf16, #tpu.memory_space<vmem>>, vector<16x64xbf16>
    %cst = arith.constant dense<0.000000e+00> : vector<8x64xf32>
    %9 = tpu.matmul %7, %8, %cst {dimension_numbers = #tpu.dot_dimension_numbers<[1], [0], [0], [1], [0, 0, 1, 1], [], []>} : vector<8x16xbf16>, vector<16x64xbf16>, vector<8x64xf32> -> vector<8x64xf32>
    %10 = arith.truncf %6 : vector<8x16xf32> to vector<8x16xbf16>
    %c0_5 = arith.constant 0 : index
    %c0_6 = arith.constant 0 : index
    %11 = vector.load %arg4[%c0_5, %c0_6] : memref<16x64xbf16, #tpu.memory_space<vmem>>, vector<16x64xbf16>
    %cst_7 = arith.constant dense<0.000000e+00> : vector<8x64xf32>
    %12 = tpu.matmul %10, %11, %cst_7 {dimension_numbers = #tpu.dot_dimension_numbers<[1], [0], [0], [1], [0, 0, 1, 1], [], []>} : vector<8x16xbf16>, vector<16x64xbf16>, vector<8x64xf32> -> vector<8x64xf32>
    %13 = arith.addf %9, %12 : vector<8x64xf32>
    %c0_8 = arith.constant 0 : index
    %c0_9 = arith.constant 0 : index
    %14 = vector.load %arg5[%c0_8, %c0_9] : memref<1x64xf32, #tpu.memory_space<vmem>>, vector<1x64xf32>
    %15 = vector.broadcast %14 : vector<1x64xf32> to vector<8x64xf32>
    %16 = arith.addf %13, %15 : vector<8x64xf32>
    %cst_10 = arith.constant 5.000000e-01 : f32
    %17 = vector.broadcast %cst_10 : f32 to vector<8x64xf32>
    %18 = arith.mulf %17, %16 : vector<8x64xf32>
    %cst_11 = arith.constant 4.471500e-02 : f32
    %19 = vector.broadcast %cst_11 : f32 to vector<8x64xf32>
    %20 = arith.mulf %19, %16 : vector<8x64xf32>
    %21 = arith.mulf %20, %16 : vector<8x64xf32>
    %22 = arith.mulf %21, %16 : vector<8x64xf32>
    %23 = arith.addf %16, %22 : vector<8x64xf32>
    %cst_12 = arith.constant 0.797884583 : f32
    %24 = vector.broadcast %cst_12 : f32 to vector<8x64xf32>
    %25 = arith.mulf %24, %23 : vector<8x64xf32>
    %26 = math.tanh %25 : vector<8x64xf32>
    %cst_13 = arith.constant 1.000000e+00 : f32
    %27 = vector.broadcast %cst_13 : f32 to vector<8x64xf32>
    %28 = arith.addf %27, %26 : vector<8x64xf32>
    %29 = arith.mulf %18, %28 : vector<8x64xf32>
    %30 = arith.truncf %29 : vector<8x64xf32> to vector<8x64xbf16>
    %c0_14 = arith.constant 0 : index
    %c0_15 = arith.constant 0 : index
    %31 = vector.load %arg6[%c0_14, %c0_15] : memref<64x128xbf16, #tpu.memory_space<vmem>>, vector<64x128xbf16>
    %cst_16 = arith.constant dense<0.000000e+00> : vector<8x128xf32>
    %32 = tpu.matmul %30, %31, %cst_16 {dimension_numbers = #tpu.dot_dimension_numbers<[1], [0], [0], [1], [0, 0, 1, 1], [], []>} : vector<8x64xbf16>, vector<64x128xbf16>, vector<8x128xf32> -> vector<8x128xf32>
    %c0_17 = arith.constant 0 : index
    %c0_18 = arith.constant 0 : index
    %33 = vector.load %arg7[%c0_17, %c0_18] : memref<1x128xf32, #tpu.memory_space<vmem>>, vector<1x128xf32>
    %34 = vector.broadcast %33 : vector<1x128xf32> to vector<8x128xf32>
    %35 = arith.addf %32, %34 : vector<8x128xf32>
    %c0_19 = arith.constant 0 : index
    %c0_20 = arith.constant 0 : index
    %36 = vector.load %arg8[%c0_19, %c0_20] : memref<8x128xf32, #tpu.memory_space<vmem>>, vector<8x128xf32>
    tpu.vector_store %arg8[%c0_19, %c0_20], %35 {strides = array<i32>} : memref<8x128xf32, #tpu.memory_space<vmem>>, vector<8x128xf32>,
    return
  }
  func.func @transform_0(%arg0: i32) -> (i32, i32) {
    %c0_i32 = arith.constant 0 : i32
    %c0_i32_0 = arith.constant 0 : i32
    return %arg0, %c0_i32 : i32, i32
  }
  func.func @transform_1(%arg0: i32) -> (i32, i32) {
    %c0_i32 = arith.constant 0 : i32
    %c0_i32_0 = arith.constant 0 : i32
    %c0_i32_1 = arith.constant 0 : i32
    return %c0_i32, %c0_i32_0 : i32, i32
  }
  func.func @transform_2(%arg0: i32) -> (i32, i32) {
    %c0_i32 = arith.constant 0 : i32
    %c0_i32_0 = arith.constant 0 : i32
    %c0_i32_1 = arith.constant 0 : i32
    return %c0_i32, %c0_i32_0 : i32, i32
  }
  func.func @transform_3(%arg0: i32) -> (i32, i32) {
    %c0_i32 = arith.constant 0 : i32
    %c0_i32_0 = arith.constant 0 : i32
    %c0_i32_1 = arith.constant 0 : i32
    return %c0_i32, %c0_i32_0 : i32, i32
  }
  func.func @transform_4(%arg0: i32) -> (i32, i32) {
    %c0_i32 = arith.constant 0 : i32
    %c0_i32_0 = arith.constant 0 : i32
    %c0_i32_1 = arith.constant 0 : i32
    return %c0_i32, %c0_i32_0 : i32, i32
  }
  func.func @transform_5(%arg0: i32) -> (i32, i32) {
    %c0_i32 = arith.constant 0 : i32
    %c0_i32_0 = arith.constant 0 : i32
    %c0_i32_1 = arith.constant 0 : i32
    return %c0_i32, %c0_i32_0 : i32, i32
  }
  func.func @transform_6(%arg0: i32) -> (i32, i32) {
    %c0_i32 = arith.constant 0 : i32
    %c0_i32_0 = arith.constant 0 : i32
    %c0_i32_1 = arith.constant 0 : i32
    return %c0_i32, %c0_i32_0 : i32, i32
  }
  func.func @transform_7(%arg0: i32) -> (i32, i32) {
    %c0_i32 = arith.constant 0 : i32
    %c0_i32_0 = arith.constant 0 : i32
    return %arg0, %c0_i32 : i32, i32
  }
}

</mosaic_0001>

<bundles_post_ra>
// kernel: tpu_custom_call.1
= control target key start
LH: loop header
LB: loop body
LE: loop exit
PB: predicated region body
PF: predicated region fallthrough
CT: control target
= control target key end

     0   :  { %12 = vsyncpa [#allocation3], 0  ;;  %s799_s0 = inlined_call_operand.vmem [shape: f32[8,1], index: 0, kind: input, shape index: {}]   ;;  %s800_s1 = inlined_call_operand.hbm [shape: f32[1,16], index: 1, kind: input, shape index: {}]   ;;  %s801_s2 = inlined_call_operand.vmem [shape: bf16[16,64], index: 2, kind: input, shape index: {}]   ;;  %s802_s3 = inlined_call_operand.vmem [shape: bf16[16,64], index: 3, kind: input, shape index: {}]   ;;  %s803_s4 = inlined_call_operand.vmem [shape: f32[1,64], index: 4, kind: input, shape index: {}]   ;;  %s804_s5 = inlined_call_operand.hbm [shape: bf16[64,128], index: 5, kind: input, shape index: {}]   ;;  %s805_s6 = inlined_call_operand.vmem [shape: f32[1,128], index: 6, kind: input, shape index: {}]   ;;  %s806_s7 = inlined_call_operand.hbm [shape: f32[8,128], index: 7, kind: output, shape index: {}]  }
   0x1   :  { %13 = vsyncpa [#allocation6], 0 }
   0x2   :  { %14 = vsyncpa [#allocation4], 0  ;;  %s654_s24 = smov [#allocation2]   ;;  %s655_s26 = smov [#allocation5]  }
   0x3   :  { %s23_s25 = sshll.u32 %s654_s24, 4  ;;  %s38_s27 = sshll.u32 %s655_s26, 4  ;;  %s24_s25 = int_to_ptr.vmem [resolvable:$true] %s23_s25  ;;  %s708_s27 = int_to_ptr.vmem [resolvable:$true] %s38_s27 }
   0x4   :  { %s582_s30 = scalar_lea.hbm %s800_s1, 16 }
   0x5   :  { %p583_p0 = scmp.ne.s32.totalorder %s800_s1, %s582_s30  ;;  %p586_p1 = scmp.lt.u32.totalorder %s582_s30, %s800_s1 }
   0x7   :  { %p588_p2 = pnand %p586_p1, %p583_p0 }
   0x9   :  { %591 = shalt.err (!%p588_p2)
}
   0xa   :  { %s592_s12 = scalar_lea.vmem %s24_s25, 16  ;;  %s596_s13 = scalar_lea.vmem %s24_s25, 32 }
   0xb   :  { %p593_p3 = scmp.ne.s32.totalorder %s24_s25, %s592_s12  ;;  %p597_p4 = scmp.lt.s32.totalorder %s24_s25, %s24_s25 }
   0xc   :  { %p598_p5 = scmp.lt.s32.totalorder %s596_s13, %s592_s12 }
   0xe   :  { %p599_p6 = por %p598_p5, %p597_p4 }
  0x10   :  { %p600_p7 = pnand %p599_p6, %p593_p3 }
  0x12   :  { %603 = shalt.err (!%p600_p7)
}
  0x13   :  { %26 = dma.hbm_to_vmem [thread:$0]  %s800_s1, 16, %s24_s25, [#allocation3]  }
  0x14   :  { %s604_s18 = scalar_lea.hbm %s804_s5, 512 }
  0x15   :  { %p605_p8 = scmp.ne.s32.totalorder %s804_s5, %s604_s18  ;;  %p608_p9 = scmp.lt.u32.totalorder %s604_s18, %s804_s5 }
  0x17   :  { %p610_p10 = pnand %p608_p9, %p605_p8 }
  0x19   :  { %613 = shalt.err (!%p610_p10)
}
  0x1a   :  { %s614_s23 = scalar_lea.vmem %s708_s27, 512  ;;  %p619_p12 = scmp.lt.s32.totalorder %s708_s27, %s708_s27 }
  0x1b   :  { %p615_p11 = scmp.ne.s32.totalorder %s708_s27, %s614_s23  ;;  %p620_p13 = scmp.lt.s32.totalorder %s614_s23, %s614_s23 }
  0x1d   :  { %p621_p0 = por %p620_p13, %p619_p12 }
  0x1f   :  { %p622_p1 = pnand %p621_p0, %p615_p11 }
  0x21   :  { %625 = shalt.err (!%p622_p1)
}
  0x22   :  { %s656_s1 = smov 64   ;;  %s657_s24 = smov 4  }
  0x23   :  { %44 = dma.hbm_to_vmem [thread:$0]  %s804_s5, 512, %s708_s27, [#allocation6], %s656_s1, %s656_s1, %s657_s24  }
  0x24   :  { %648 = dma.done.wait [#allocation3], 16  }
  0x25   :  { %649 = vsyncadd [#allocation3], 4294967280 }
  0x26   :  { %650 = dma.done.wait [#allocation6], 512  }
  0x27   :  { %651 = vsyncadd [#allocation6], 4294966784  ;;  %v658_v0 = vmov 0   ;;  %v54_v1 = vld [vmem:[%s799_s0] sm:$0xff]  ;;  %v659_v3 = vmov 0.0   ;;  %vm660_vm0 = vmmov 0  }
  0x28   :  { %569 = vset.pattern.permute.xlu0 %v658_v0  ;;  %v570_v2 = vld [vmem:[%s802_s3] sm:$0xff]   ;;  %527 = vmatprep.subr.bf16.mxu1 %v659_v3  ;;  %v661_v17 = vmov 683565275   ;;  %v662_v19 = vmov 2475754826   ;;  %s667_s9 = smov [#allocation7]  }
  0x29   :  { %58 = vperm.xlu0 %569, %v54_v1   ;;  %529 = vmatprep.mubr.msk.bf16.mxu1 %vm660_vm0, %v659_v3  ;;  %v498_v4 = vld [vmem:[#allocation2] ss:$0 sm:$0xff]  ;;  %v663_v22 = vmov 2131351028   ;;  %v664_v25 = vmov 2102212464  }
  0x2a   :  { %528 = vmatpush3.bf16.msra.mxu1 %v570_v2  ;;  %539 = vmatprep.subr.bf16.mxu0 %v659_v3  ;;  %v665_v28 = vmov 920167782   ;;  %v666_v31 = vmov 1326507024   ;;  %s488_s10 = sshll.u32 %s667_s9, 4  ;;  %s489_s10 = int_to_ptr.vmem [resolvable:$true] %s488_s10 }
  0x2b   :  { %533 = vmatprep.subr.bf16.mxu1 %v659_v3  ;;  %547 = vmatprep.mubr.msk.bf16.mxu0 %vm660_vm0, %v659_v3  ;;  %s626_s11 = scalar_lea.vmem %s489_s10, 128  ;;  %p631_p3 = scmp.lt.s32.totalorder %s489_s10, %s489_s10 }
  0x2c   :  { %p627_p2 = scmp.ne.s32.totalorder %s489_s10, %s626_s11  ;;  %p632_p4 = scmp.lt.s32.totalorder %s626_s11, %s626_s11 }
  0x2e   :  { %p633_p5 = por %p632_p4, %p631_p3 }
  0x30   :  { %p634_p6 = pnand %p633_p5, %p627_p2 }
  0xa8   :  { %v59_v5 = vpop.permute.xlu0 %58 }
  0xa9   :  { %v752_v6 = vmul.f32 %v498_v4, %v59_v5 }
  0xab   :  { %v71_v7 = vand.u32 2139095040, %v752_v6  ;;  %v68_v11 = vand.u32 2147483647, %v752_v6  ;;  %vm70_vm8 = vcmp.lt.s32.totalorder %v752_v6, 0  ;;  %vm160_vm13 = vweird.f32 %v752_v6 }
  0xad   :  { %v72_v8 = vshrl.u32 %v71_v7, 23  ;;  %v75_v14 = vand.u32 8388607, %v68_v11  ;;  %vm69_vm9 = vcmp.le.f32.partialorder %v68_v11, 0.7853982 }
  0xaf   :  { %v499_v9 = vadd.s32 4294967169, %v72_v8  ;;  %v76_v33 = vor.u32 8388608, %v75_v14 }
  0xb1   :  { %v78_v10 = vadd.s32 1, %v499_v9  ;;  %v116_v47 = vshll.u32 %v76_v33, 8 }
  0xb3   :  { %vm79_vm1 = vcmp.gt.s32.totalorder %v78_v10, 0 }
  0xb4   :  { %v80_v12 = vsel %vm79_vm1, %v78_v10, 0  ;;  %vm287_vm1 = vcmask 130048  }
  0xb5   :  { %v82_v13 = vand.u32 31, %v80_v12  ;;  %v81_v16 = vshrl.u32 %v80_v12, 5 }
  0xb7   :  { %v83_v15 = vsub.s32 32, %v82_v13  ;;  %v85_v18 = vshll.u32 %v661_v17, %v82_v13  ;;  %v88_v20 = vshll.u32 %v662_v19, %v82_v13  ;;  %v91_v24 = vshll.u32 %v663_v22, %v82_v13 }
  0xb8   :  { %v94_v27 = vshll.u32 %v664_v25, %v82_v13  ;;  %v97_v30 = vshll.u32 %v665_v28, %v82_v13  ;;  %vm100_vm2 = vcmp.lt.s32.totalorder %v81_v16, 1  ;;  %vm103_vm3 = vcmp.lt.s32.totalorder %v81_v16, 4 }
  0xb9   :  { %v86_v21 = vshrl.u32 %v662_v19, %v83_v15  ;;  %v89_v23 = vshrl.u32 %v663_v22, %v83_v15  ;;  %v92_v26 = vshrl.u32 %v664_v25, %v83_v15  ;;  %v95_v29 = vshrl.u32 %v665_v28, %v83_v15 }
  0xba   :  { %v98_v32 = vshrl.u32 %v666_v31, %v83_v15  ;;  %v84_v42 = vshrl.u32 %v661_v17, %v83_v15  ;;  %vm102_vm4 = vcmp.lt.s32.totalorder %v81_v16, 3  ;;  %vm101_vm5 = vcmp.lt.s32.totalorder %v81_v16, 2 }
  0xbb   :  { %v87_v34 = vor.u32 %v86_v21, %v85_v18  ;;  %v90_v35 = vor.u32 %v89_v23, %v88_v20  ;;  %v93_v36 = vor.u32 %v92_v26, %v91_v24  ;;  %v96_v37 = vor.u32 %v95_v29, %v94_v27 }
  0xbc   :  { %v99_v38 = vor.u32 %v98_v32, %v97_v30 }
  0xbd   :  { %v105_v39 = vsel %vm103_vm3, %v93_v36, 2102212464  ;;  %v108_v40 = vsel %vm100_vm2, %v87_v34, %v90_v35  ;;  %v112_v41 = vsel %vm100_vm2, %v90_v35, %v93_v36  ;;  %v109_v43 = vsel %vm103_vm3, %v96_v37, 920167782 }
  0xbe   :  { %v113_v44 = vsel %vm103_vm3, %v99_v38, 1326507024  ;;  %v110_v45 = vsel %vm102_vm4, %v93_v36, %v109_v43  ;;  %v104_v48 = vsel %vm100_vm2, %v84_v42, %v87_v34  ;;  %v106_v49 = vsel %vm102_vm4, %v90_v35, %v105_v39  ;;  %v571_v39 = vld [vmem:[%s801_s2] sm:$0xff]  }
  0xbf   :  { %v114_v46 = vsel %vm102_vm4, %v96_v37, %v113_v44  ;;  %v111_v50 = vsel %vm101_vm5, %v108_v40, %v110_v45  ;;  %v107_v56 = vsel %vm101_vm5, %v104_v48, %v106_v49  ;;  %v572_v43 = vld [vmem:[#allocation5] sm:$0xff]   ;;  %v573_v44 = vld [vmem:[#allocation5 + $0x8] sm:$0xff]   ;;  %v574_v45 = vld [vmem:[#allocation5 + $0x10] sm:$0xff]  }
  0xc0   :  { %v115_v51 = vsel %vm101_vm5, %v112_v41, %v114_v46  ;;  %v761_v54 = vmul.u32.u64.low %v116_v47, %v111_v50  ;;  %v762_v55 = vmul.u32.u64.high %v116_v47, %v111_v50, %v761_v54  ;;  %v123_v58 = vmul.u32 %v116_v47, %v107_v56  ;;  %540 = vmatpush3.bf16.msra.mxu0 %v572_v43  ;;  %v575_v46 = vld [vmem:[#allocation5 + $0x18] sm:$0xff]  }
  0xc1   :  { %v758_v52 = vmul.u32.u64.low %v116_v47, %v115_v51  ;;  %v759_v53 = vmul.u32.u64.high %v116_v47, %v115_v51, %v758_v52  ;;  %541 = vmatprep.subr.bf16.mxu0 %v659_v3 }
  0xc2   :  { %v126_v57 = vadd.s32 1, %v762_v55  ;;  %v511_v52 = vld [vmem:[%s803_s4] ss:$0 sm:$0xff] }
  0xc3   :  { %vm125_vm6 = vc.u32 %v759_v53, %v761_v54  ;;  %v124_v8 = vadd.s32 %v761_v54, %v759_v53 }
  0xc4   :  { %v127_v59 = vsel %vm125_vm6, %v126_v57, %v762_v55  ;;  %542 = vmatpush3.bf16.msra.mxu0 %v573_v44 }
  0xc5   :  { %v128_v60 = vadd.s32 %v127_v59, %v123_v58  ;;  %543 = vmatprep.subr.bf16.mxu0 %v659_v3 }
  0xc7   :  { %v129_v61 = vadd.s32 536870912, %v128_v60 }
  0xc8   :  { %544 = vmatpush3.bf16.msra.mxu0 %v574_v45 }
  0xc9   :  { %v130_v62 = vshrl.u32 %v129_v61, 30  ;;  %545 = vmatprep.subr.bf16.mxu0 %v659_v3 }
  0xcb   :  { %v131_v63 = vshll.u32 %v130_v62, 30  ;;  %v154_v22 = vsub.s32 4, %v130_v62 }
  0xcc   :  { %546 = vmatpush3.bf16.msra.mxu0 %v575_v46 }
  0xcd   :  { %v132_v0 = vsub.s32 %v128_v60, %v131_v63  ;;  %v155_v25 = vsel %vm70_vm8, %v154_v22, %v130_v62 }
  0xce   :  { %v157_v26 = vsel %vm69_vm9, 0, %v155_v25 }
  0xcf   :  { %v134_v1 = vsub.s32 0, %v132_v0  ;;  %v161_v27 = vadd.s32 3, %v157_v26  ;;  %v265_v28 = vand.u32 3, %v157_v26 }
  0xd1   :  { %v500_v2 = vmin.u32 %v134_v1, %v132_v0  ;;  %v162_v31 = vand.u32 3, %v161_v27  ;;  %vm270_vm10 = vcmp.eq.s32.totalorder %v265_v28, 2  ;;  %vm267_vm11 = vcmp.eq.s32.totalorder %v265_v28, 0 }
  0xd2   :  { %vm266_vm12 = vcmp.lt.s32.totalorder %v265_v28, 2 }
  0xd3   :  { %v136_v4 = vclz %v500_v2  ;;  %vm164_vm14 = vcmp.eq.s32.totalorder %v162_v31, 0  ;;  %vm167_vm15 = vcmp.eq.s32.totalorder %v162_v31, 2  ;;  %vm163_vm2 = vcmp.lt.s32.totalorder %v162_v31, 2 }
  0xd5   :  { %v501_v5 = vadd.s32 4294967294, %v136_v4  ;;  %v512_v4 = vld [vmem:[%s805_s6] ss:$0 sm:$0xff] }
  0xd7   :  { %vm502_vm7 = vcmp.lt.s32.totalorder %v501_v5, 0 }
  0xd8   :  { %v139_v7 = vsel %vm502_vm7, 0, %v501_v5 }
  0xd9   :  { %v140_v9 = vsub.s32 32, %v139_v7  ;;  %v144_v10 = vsub.s32 4294967266, %v139_v7  ;;  %v141_v12 = vshll.u32 %v132_v0, %v139_v7 }
  0xdb   :  { %v142_v13 = vshrl.u32 %v124_v8, %v140_v9  ;;  %v145_v14 = vadd.s32 127, %v144_v10 }
  0xdd   :  { %v143_v15 = vor.u32 %v142_v13, %v141_v12  ;;  %v146_v16 = vshll.u32 %v145_v14, 23 }
  0xdf   :  { %v147_v17 = vor.u32 4788187, %v146_v16  ;;  %v150_v19 = vcvt.s32.f32 %v143_v15 }
  0xe1   :  { %v148_v18 = vand.u32 2147483647, %v147_v17 }
  0xe3   :  { %v151_v20 = vmul.f32 %v150_v19, %v148_v18 }
  0xe5   :  { %v152_v21 = vxor.u32 2147483648, %v151_v20 }
  0xe7   :  { %v153_v23 = vsel %vm70_vm8, %v152_v21, %v151_v20 }
  0xe8   :  { %v156_v24 = vsel %vm69_vm9, %v752_v6, %v153_v23 }
  0xe9   :  { %576 = vcosq.f32 %v156_v24 }
  0xea   :  { %578 = vsinq.f32 %v156_v24 }
  0xf3   :  { %v577_v29 = vpop.eup %576 }
  0xf4   :  { %v579_v30 = vpop.eup %578  ;;  %v168_v32 = vxor.u32 2147483648, %v577_v29 }
  0xf5   :  { %v165_v33 = vxor.u32 2147483648, %v579_v30 }
  0xf6   :  { %v272_v34 = vsel %vm270_vm10, %v168_v32, %v579_v30  ;;  %v169_v37 = vsel %vm167_vm15, %v168_v32, %v579_v30 }
  0xf7   :  { %v269_v35 = vsel %vm267_vm11, %v577_v29, %v165_v33  ;;  %v166_v36 = vsel %vm164_vm14, %v577_v29, %v165_v33 }
  0xf8   :  { %v273_v11 = vsel %vm266_vm12, %v269_v35, %v272_v34  ;;  %v170_v41 = vsel %vm163_vm2, %v166_v36, %v169_v37 }
  0xf9   :  { %v274_v38 = vsel %vm160_vm13, nan, %v273_v11  ;;  %v171_v6 = vsel %vm160_vm13, nan, %v170_v41 }
  0xfa   :  { %v278_v40 = vpack.c.bf16 %v274_v38, %v274_v38  ;;  %v275_v42 = vpack.c.bf16 %v171_v6, %v171_v6 }
  0xfc   :  { %530 = vmatmul.mubr.msk.bf16.vlgmr.msra.gmra.mrb[0].mxu1 %vm287_vm1, %v278_v40 }
  0xfd   :  { %534 = vmatpush3.bf16.msra.mxu1 %v571_v39  ;;  %535 = vmatprep.mubr.msk.bf16.mxu1 %vm660_vm0, %v659_v3  ;;  %vm437_vm0 = vcmask 523264  }
 0x104   :  { %536 = vmatmul.mubr.msk.bf16.vlgmr.msra.gmra.mrb[4].mxu1 %vm287_vm1, %v275_v42 }
 0x1cf   :  { %v325_v47 = vpop.f32.mrb[0].mxu1 }
 0x1d0   :  { %v531_v48 = vpop.f32.mrb[1].mxu1 }
 0x1d1   :  { %v328_v49 = vpop.f32.mrb[2].mxu1 }
 0x1d2   :  { %v532_v50 = vpop.f32.mrb[3].mxu1 }
 0x1d7   :  { %v374_v51 = vpop.f32.mrb[4].mxu1 }
 0x1d8   :  { %v375_v53 = vadd.f32 %v374_v51, %v325_v47  ;;  %v537_v54 = vpop.f32.mrb[5].mxu1 }
 0x1d9   :  { %v377_v55 = vpop.f32.mrb[6].mxu1 }
 0x1da   :  { %v387_v56 = vadd.f32 %v511_v52, %v375_v53  ;;  %v538_v57 = vpop.f32.mrb[7].mxu1 }
 0x1dc   :  { %v389_v58 = vmul.f32 0.044715, %v387_v56  ;;  %v388_v63 = vmul.f32 0.5, %v387_v56 }
 0x1de   :  { %v390_v59 = vmul.f32 %v389_v58, %v387_v56 }
 0x1e0   :  { %v391_v60 = vmul.f32 %v390_v59, %v387_v56 }
 0x1e2   :  { %v392_v61 = vadd.f32 %v391_v60, %v387_v56 }
 0x1e4   :  { %v393_v3 = vmul.f32 0.7978846, %v392_v61 }
 0x1e6   :  { %580 = vtanh.f32 %v393_v3 }
 0x1f0   :  { %v581_v62 = vpop.eup %580 }
 0x1f1   :  { %v395_v0 = vadd.f32 1.0, %v581_v62 }
 0x1f3   :  { %v396_v1 = vmul.f32 %v395_v0, %v388_v63 }
 0x1f5   :  { %v397_v2 = vpack.c.bf16 %v396_v1, %v396_v1 }
 0x1f7   :  { %548 = vmatmul.mubr.msk.bf16.vlgmr.msra.gmra.mrb[0].mxu0 %vm437_vm0, %v397_v2 }
 0x2ca   :  { %v475_v5 = vpop.f32.mrb[0].mxu0 }
 0x2cb   :  { %v476_v7 = vadd.f32 %v512_v4, %v475_v5  ;;  %v549_v8 = vpop.f32.mrb[1].mxu0 }
 0x2cc   :  { %v478_v9 = vpop.f32.mrb[2].mxu0 }
 0x2cd   :  { %481 = vst [vmem:[#allocation7] sm:$0xff] %v476_v7  ;;  %v550_v10 = vpop.f32.mrb[3].mxu0 }
 0x2ce   :  { %637 = shalt.err (!%p634_p6)
}
 0x2cf   :  { %s638_s6 = scalar_lea.hbm %s806_s7, 128 }
 0x2d0   :  { %p639_p7 = scmp.ne.s32.totalorder %s806_s7, %s638_s6  ;;  %p642_p8 = scmp.lt.u32.totalorder %s638_s6, %s806_s7 }
 0x2d2   :  { %p644_p9 = pnand %p642_p8, %p639_p7 }
 0x2d4   :  { %647 = shalt.err (!%p644_p9)
}
 0x2d5   :  { %491 = dma.vmem_to_hbm [thread:$0]  %s489_s10, 128, %s806_s7, [#allocation4]  }
 0x2d6   :  { %652 = dma.done.wait [#allocation4], 128  }
 0x2d7   :  { %653 = vsyncadd [#allocation4], 4294967168 }
 0x2d8   :  { %495 = vsyncpa [#allocation3], 1 }
 0x2d9   :  { %496 = vsyncpa [#allocation6], 1 }
 0x2da   :  { %497 = vsyncpa [#allocation4], 1 }

</bundles_post_ra>
